<compile_context>
chip_gen: v6e
topology: v6e:2x2x1
jax: 0.10.0
libtpu: 0.0.40
codegen_flags: <defaults>
</compile_context>

<pallas_src>
import math
from functools import partial

import jax
import jax.numpy as jnp
from jax import lax
from jax.experimental import pallas as pl
from jax.experimental.pallas import tpu as pltpu


def att_patches_kernel(x_ref, qp_ref, wol_ref, b_ref, o_ref, *,
                       bblk, c_in, c_out, compute_dtype):
    """One grid step: bblk batch elements.

    x_ref:   (bblk*C_in, N)    f32 activations (cast to compute_dtype in VMEM)
    qp_ref:  (C_out, N)        pre-fused  scale * Q @ Wk^T        (compute_dtype)
    wol_ref: (N, Dp)           pre-fused  Wo @ Wlin, lane-padded  (compute_dtype)
    b_ref:   (1, Dp)           f32 bias (lane-padded)
    o_ref:   (bblk*C_out, Dp)  f32 output slab
    """
    n = x_ref.shape[-1]
    d_pad = wol_ref.shape[-1]

    x = x_ref[...].astype(compute_dtype)      # per-tile cast; hidden under the MXU
    qp = qp_ref[...]                           # (C_out, N)
    wol = wol_ref[...]                         # (N, Dp)
    bias = b_ref[...]                          # (1, Dp) f32

    # Re-associated tail: XW = X @ (Wo Wlin) — the single dominant MXU matmul,
    # M = bblk*C_in rows on the flat activation slab.
    xw = lax.dot_general(x, wol, (((1,), (0,)), ((), ())),
                         preferred_element_type=jnp.float32)      # (bblk*C_in, Dp) f32

    ys = []
    for b in range(bblk):                      # static unroll over the batch block
        r0 = b * c_in
        x_b = x[r0:r0 + c_in, :]               # (C_in, N)
        xw_b = xw[r0:r0 + c_in, :]             # (C_in, Dp) f32

        # Scores: Qp X_b^T (Wk and 1/sqrt(N) already folded into Qp), contract on N.
        s = lax.dot_general(qp, x_b, (((1,), (1,)), ((), ())),
                            preferred_element_type=jnp.float32)   # (C_out, C_in)

        # Softmax over the channel-token (lane) axis, in f32.
        s = s - jnp.max(s, axis=-1, keepdims=True)
        p = jnp.exp(s)
        a = p * pl.reciprocal(jnp.sum(p, axis=-1, keepdims=True), approx=True)

        # Attend with the tail already applied: Y_b = A_b @ XW_b.  K = C_in is tiny,
        # so do it as unrolled VPU broadcast-multiply-accumulates (free VALU filler).
        if c_in <= 16:
            y = a[:, 0:1] * xw_b[0:1, :]
            for c in range(1, c_in):
                y = y + a[:, c:c + 1] * xw_b[c:c + 1, :]
        else:
            y = jnp.dot(a, xw_b, preferred_element_type=jnp.float32)
        ys.append(y)                            # (C_out, Dp) f32

    y_all = jnp.concatenate(ys, axis=0) if bblk > 1 else ys[0]     # (bblk*C_out, Dp)
    o_ref[...] = (y_all + bias).astype(o_ref.dtype)                # dense lane-wide vst


def _device_info():
    kind = ""
    try:
        kind = jax.devices()[0].device_kind.lower()
    except Exception:
        pass
    try:
        vmem_cap = int(pltpu.get_tpu_info().vmem_capacity_bytes)
    except Exception:
        vmem_cap = 64 << 20                     # conservative (v7x-sized) fallback
    return kind, vmem_cap


def _pick_block_b(B, c_in, *, m_target, legal, fits, footprint):
    """Largest/best divisor of B subject to: BlockSpec legality > VMEM fit >
    >=2 grid steps (megacore) > MXU M-dim target on the flattened matmul rows."""
    divs = [d for d in range(1, B + 1) if B % d == 0 and legal(d)]
    fit = [d for d in divs if fits(d)] or [min(divs, key=footprint)]
    pref = [d for d in fit if B // d >= 2] or fit
    reach = [d for d in pref if d * c_in >= m_target]
    return min(reach) if reach else max(pref)


def att_patches(x, q, wk, wo, wlin, bias, *, compute_dtype=jnp.bfloat16, block_b=None):
    """x: (B, C_in, H, W) float32 -> (B, C_out, dim_out) float32."""
    B, C_in, H, W = x.shape
    N = H * W
    C_out = q.shape[0]
    dim_out = wlin.shape[1]

    # --- batch-independent algebraic folds (done once, in f32, outside the kernel) ---
    scale = 1.0 / math.sqrt(float(N))
    qp = (q @ wk.T) * scale                     # (C_out, N)   : fold #1 (Wk into Q)
    wol = wo @ wlin                             # (N, dim_out) : fold #2 (Wo into Wlin)

    # Lane-dense output: pad feature dim to the next multiple of 128 (only if needed).
    d_pad = ((dim_out + 127) // 128) * 128
    if d_pad != dim_out:
        wol_p = jnp.zeros((N, d_pad), jnp.float32).at[:, :dim_out].set(wol)
        bias_p = jnp.zeros((1, d_pad), jnp.float32).at[:, :dim_out].set(
            bias.reshape(1, dim_out))
    else:
        wol_p = wol
        bias_p = bias.reshape(1, dim_out)

    qp = qp.astype(compute_dtype)
    wol_p = wol_p.astype(compute_dtype)

    # x stays f32 in HBM (no extra wrapper cast pass); kernel casts per tile.
    x2 = x.reshape(B * C_in, N)                 # Rearrange('b c h w -> b c (h w)'), flat

    # --- generation-aware tiling -----------------------------------------------------
    kind, vmem_cap = _device_info()
    is_v5 = "v5" in kind
    is_v7 = "v7" in kind
    m_target = 128 if is_v5 else 256            # MXU M-dim fill target (256x256 on v6e/v7x)
    cbytes = jnp.dtype(compute_dtype).itemsize
    w_mult = 1 if is_v7 else 2                  # Buffered(1) weights on v7x => single buffer
    w_bytes = (C_out * N + N * d_pad) * cbytes + d_pad * 4

    def footprint(d):
        rows_x, rows_o = d * C_in, d * C_out
        io = 2 * (rows_x * N * 4 + rows_o * d_pad * 4)                 # double-buffered blocks
        tmp = rows_x * (N * cbytes + d_pad * 4) + rows_o * d_pad * 4   # cast copy, XW, Y slab
        return io + w_mult * w_bytes + tmp

    def legal(d):
        rows_x, rows_o = d * C_in, d * C_out
        return ((rows_x % 8 == 0 or rows_x == B * C_in) and
                (rows_o % 8 == 0 or rows_o == B * C_out))

    budget = int(vmem_cap * 0.5)
    if block_b is None:
        bblk = _pick_block_b(B, C_in, m_target=m_target, legal=legal,
                             fits=lambda d: footprint(d) <= budget, footprint=footprint)
    else:
        bblk = block_b
    assert B % bblk == 0 and legal(bblk), (B, bblk)

    rows_x = bblk * C_in
    rows_o = bblk * C_out
    vmem_limit = int(min(int(vmem_cap * 0.9), max(32 << 20, 2 * footprint(bblk))))

    # Batch-invariant weights: single-buffer them on v7x (64 MiB VMEM) — they never change.
    const_kwargs = dict(pipeline_mode=pl.Buffered(1)) if is_v7 else {}
    qp_spec = pl.BlockSpec((C_out, N), lambda b: (0, 0), **const_kwargs)
    wol_spec = pl.BlockSpec((N, d_pad), lambda b: (0, 0), **const_kwargs)
    bias_spec = pl.BlockSpec((1, d_pad), lambda b: (0, 0), **const_kwargs)

    kernel = partial(att_patches_kernel, bblk=bblk, c_in=C_in, c_out=C_out,
                     compute_dtype=compute_dtype)

    out2 = pl.pallas_call(
        kernel,
        out_shape=jax.ShapeDtypeStruct((B * C_out, d_pad), jnp.float32),
        grid_spec=pltpu.PrefetchScalarGridSpec(
            num_scalar_prefetch=0,
            grid=(B // bblk,),
            in_specs=[
                pl.BlockSpec((rows_x, N), lambda b: (b, 0)),
                qp_spec,
                wol_spec,
                bias_spec,
            ],
            out_specs=pl.BlockSpec((rows_o, d_pad), lambda b: (b, 0)),
        ),
        compiler_params=pltpu.CompilerParams(
            dimension_semantics=("parallel",),
            vmem_limit_bytes=vmem_limit,
        ),
    )(x2, qp, wol_p, bias_p)

    out = out2.reshape(B, C_out, d_pad)         # free (contiguous) reshape
    if d_pad != dim_out:
        out = out[:, :, :dim_out]               # strip lane padding only when needed
    return out


def init_params(key, in_channel, out_channel, image_size, dim_out):
    N = image_size * image_size
    kq, kk, ko, kl, kb = jax.random.split(key, 5)
    q = jax.random.normal(kq, (out_channel, N), jnp.float32) * (1.0 / math.sqrt(N))
    wk = jax.random.normal(kk, (N, N), jnp.float32) * (1.0 / math.sqrt(N))
    wo = jax.random.normal(ko, (N, N), jnp.float32) * (1.0 / math.sqrt(N))
    # nn.Linear(N, dim_out): torch weight is (dim_out, N); store transposed (N, dim_out)
    wlin = jax.random.normal(kl, (N, dim_out), jnp.float32) * (1.0 / math.sqrt(N))
    bias = jax.random.normal(kb, (dim_out,), jnp.float32) * 0.01
    return q, wk, wo, wlin, bias


def att_patches_ref(x, q, wk, wo, wlin, bias):
    """Pure-JAX reference (unfused) for correctness check."""
    B, C_in, H, W = x.shape
    N = H * W
    x2 = x.reshape(B, C_in, N)
    k = jnp.einsum("bcn,nm->bcm", x2, wk)
    s = jnp.einsum("on,bcn->boc", q, k) / math.sqrt(N)
    a = jax.nn.softmax(s, axis=-1)
    o = jnp.einsum("boc,bcn->bon", a, x2)
    o = jnp.einsum("bon,nm->bom", o, wo)
    return jnp.einsum("bon,nd->bod", o, wlin) + bias


if __name__ == "__main__":
    batch = 2
    in_channel = 4
    out_channel = 8
    image_size = 16
    dim_out = 32

    key = jax.random.PRNGKey(0)
    kx, kp = jax.random.split(key)
    x = jax.random.normal(kx, (batch, in_channel, image_size, image_size), jnp.float32)
    q, wk, wo, wlin, bias = init_params(kp, in_channel, out_channel, image_size, dim_out)

    y_ref = att_patches_ref(x, q, wk, wo, wlin, bias)

    # f32 MXU operands (reference-accurate path).
    y32 = jax.block_until_ready(
        att_patches(x, q, wk, wo, wlin, bias, compute_dtype=jnp.float32))
    assert y32.shape == (batch, out_channel, dim_out), y32.shape
    err32 = float(jnp.max(jnp.abs(y32 - y_ref)))
    assert jnp.allclose(y32, y_ref, atol=2e-3, rtol=2e-3), err32

    # bf16 MXU operands (default fast path on all generations; f32 softmax + accumulation).
    ybf = jax.block_until_ready(
        att_patches(x, q, wk, wo, wlin, bias, compute_dtype=jnp.bfloat16))
    assert ybf.shape == (batch, out_channel, dim_out), ybf.shape
    errbf = float(jnp.max(jnp.abs(ybf - y_ref)))
    assert jnp.allclose(ybf, y_ref, atol=5e-2, rtol=5e-2), errbf

    print("KERNEL_OK")
</pallas_src>

<mosaic_0001>
module attributes {stable_mosaic.version = 11 : i64} {
  func.func @att_patches_kernel(%arg0: i32, %arg1: memref<8x256xf32, #tpu.memory_space<vmem>>, %arg2: memref<8x256xf32, #tpu.memory_space<vmem>>, %arg3: memref<256x128xf32, #tpu.memory_space<vmem>>, %arg4: memref<1x128xf32, #tpu.memory_space<vmem>>, %arg5: memref<16x128xf32, #tpu.memory_space<vmem>>) attributes {dimension_semantics = [#tpu.dimension_semantics<parallel>], iteration_bounds = array<i64: 1>, scalar_prefetch = 0 : i64, scratch_operands = 0 : i64, tpu.core_type = #tpu.core_type<tc>, window_params = [{transform_indices = @transform_0, window_bounds = array<i64: 8, 256>}, {pipeline_mode = #tpu.pipeline_mode<synchronous>, transform_indices = @transform_1, window_bounds = array<i64: 8, 256>}, {pipeline_mode = #tpu.pipeline_mode<synchronous>, transform_indices = @transform_2, window_bounds = array<i64: 256, 128>}, {pipeline_mode = #tpu.pipeline_mode<synchronous>, transform_indices = @transform_3, window_bounds = array<i64: 1, 128>}, {transform_indices = @transform_4, window_bounds = array<i64: 16, 128>}]} {
    %c0 = arith.constant 0 : index
    %c0_0 = arith.constant 0 : index
    %0 = vector.load %arg1[%c0, %c0_0] : memref<8x256xf32, #tpu.memory_space<vmem>>, vector<8x256xf32>
    %c0_1 = arith.constant 0 : index
    %c0_2 = arith.constant 0 : index
    %1 = vector.load %arg2[%c0_1, %c0_2] : memref<8x256xf32, #tpu.memory_space<vmem>>, vector<8x256xf32>
    %c0_3 = arith.constant 0 : index
    %c0_4 = arith.constant 0 : index
    %2 = vector.load %arg3[%c0_3, %c0_4] : memref<256x128xf32, #tpu.memory_space<vmem>>, vector<256x128xf32>
    %c0_5 = arith.constant 0 : index
    %c0_6 = arith.constant 0 : index
    %3 = vector.load %arg4[%c0_5, %c0_6] : memref<1x128xf32, #tpu.memory_space<vmem>>, vector<1x128xf32>
    %cst = arith.constant dense<0.000000e+00> : vector<8x128xf32>
    %4 = tpu.matmul %0, %2, %cst {dimension_numbers = #tpu.dot_dimension_numbers<[1], [0], [0], [1], [0, 0, 1, 1], [], []>} : vector<8x256xf32>, vector<256x128xf32>, vector<8x128xf32> -> vector<8x128xf32>
    %5 = vector.extract_strided_slice %0 {offsets = [0, 0], sizes = [4, 256], strides = [1, 1]} : vector<8x256xf32> to vector<4x256xf32>
    %6 = vector.extract_strided_slice %4 {offsets = [0, 0], sizes = [4, 128], strides = [1, 1]} : vector<8x128xf32> to vector<4x128xf32>
    %cst_7 = arith.constant dense<0.000000e+00> : vector<8x4xf32>
    %7 = tpu.matmul %1, %5, %cst_7 {dimension_numbers = #tpu.dot_dimension_numbers<[1], [1], [0], [0], [0, 0, 1, 0], [], []>} : vector<8x256xf32>, vector<4x256xf32>, vector<8x4xf32> -> vector<8x4xf32>
    %cst_8 = arith.constant dense<0xFF800000> : vector<8xf32>
    %8 = vector.multi_reduction <maximumf>, %7, %cst_8 [1] : vector<8x4xf32> to vector<8xf32>
    %9 = vector.shape_cast %8 : vector<8xf32> to vector<8x1xf32>
    %10 = vector.broadcast %9 : vector<8x1xf32> to vector<8x4xf32>
    %11 = arith.subf %7, %10 : vector<8x4xf32>
    %12 = math.exp %11 : vector<8x4xf32>
    %cst_9 = arith.constant dense<0.000000e+00> : vector<8xf32>
    %13 = vector.multi_reduction <add>, %12, %cst_9 [1] : vector<8x4xf32> to vector<8xf32>
    %14 = vector.shape_cast %13 : vector<8xf32> to vector<8x1xf32>
    %15 = tpu.reciprocal %14 {approx = true} : vector<8x1xf32> -> vector<8x1xf32>
    %16 = vector.broadcast %15 : vector<8x1xf32> to vector<8x4xf32>
    %17 = arith.mulf %12, %16 : vector<8x4xf32>
    %18 = vector.extract_strided_slice %17 {offsets = [0, 0], sizes = [8, 1], strides = [1, 1]} : vector<8x4xf32> to vector<8x1xf32>
    %19 = vector.extract_strided_slice %6 {offsets = [0, 0], sizes = [1, 128], strides = [1, 1]} : vector<4x128xf32> to vector<1x128xf32>
    %20 = vector.broadcast %18 : vector<8x1xf32> to vector<8x128xf32>
    %21 = vector.broadcast %19 : vector<1x128xf32> to vector<8x128xf32>
    %22 = arith.mulf %20, %21 : vector<8x128xf32>
    %23 = vector.extract_strided_slice %17 {offsets = [0, 1], sizes = [8, 1], strides = [1, 1]} : vector<8x4xf32> to vector<8x1xf32>
    %24 = vector.extract_strided_slice %6 {offsets = [1, 0], sizes = [1, 128], strides = [1, 1]} : vector<4x128xf32> to vector<1x128xf32>
    %25 = vector.broadcast %23 : vector<8x1xf32> to vector<8x128xf32>
    %26 = vector.broadcast %24 : vector<1x128xf32> to vector<8x128xf32>
    %27 = arith.mulf %25, %26 : vector<8x128xf32>
    %28 = arith.addf %22, %27 : vector<8x128xf32>
    %29 = vector.extract_strided_slice %17 {offsets = [0, 2], sizes = [8, 1], strides = [1, 1]} : vector<8x4xf32> to vector<8x1xf32>
    %30 = vector.extract_strided_slice %6 {offsets = [2, 0], sizes = [1, 128], strides = [1, 1]} : vector<4x128xf32> to vector<1x128xf32>
    %31 = vector.broadcast %29 : vector<8x1xf32> to vector<8x128xf32>
    %32 = vector.broadcast %30 : vector<1x128xf32> to vector<8x128xf32>
    %33 = arith.mulf %31, %32 : vector<8x128xf32>
    %34 = arith.addf %28, %33 : vector<8x128xf32>
    %35 = vector.extract_strided_slice %17 {offsets = [0, 3], sizes = [8, 1], strides = [1, 1]} : vector<8x4xf32> to vector<8x1xf32>
    %36 = vector.extract_strided_slice %6 {offsets = [3, 0], sizes = [1, 128], strides = [1, 1]} : vector<4x128xf32> to vector<1x128xf32>
    %37 = vector.broadcast %35 : vector<8x1xf32> to vector<8x128xf32>
    %38 = vector.broadcast %36 : vector<1x128xf32> to vector<8x128xf32>
    %39 = arith.mulf %37, %38 : vector<8x128xf32>
    %40 = arith.addf %34, %39 : vector<8x128xf32>
    %41 = vector.extract_strided_slice %0 {offsets = [4, 0], sizes = [4, 256], strides = [1, 1]} : vector<8x256xf32> to vector<4x256xf32>
    %42 = vector.extract_strided_slice %4 {offsets = [4, 0], sizes = [4, 128], strides = [1, 1]} : vector<8x128xf32> to vector<4x128xf32>
    %cst_10 = arith.constant dense<0.000000e+00> : vector<8x4xf32>
    %43 = tpu.matmul %1, %41, %cst_10 {dimension_numbers = #tpu.dot_dimension_numbers<[1], [1], [0], [0], [0, 0, 1, 0], [], []>} : vector<8x256xf32>, vector<4x256xf32>, vector<8x4xf32> -> vector<8x4xf32>
    %cst_11 = arith.constant dense<0xFF800000> : vector<8xf32>
    %44 = vector.multi_reduction <maximumf>, %43, %cst_11 [1] : vector<8x4xf32> to vector<8xf32>
    %45 = vector.shape_cast %44 : vector<8xf32> to vector<8x1xf32>
    %46 = vector.broadcast %45 : vector<8x1xf32> to vector<8x4xf32>
    %47 = arith.subf %43, %46 : vector<8x4xf32>
    %48 = math.exp %47 : vector<8x4xf32>
    %cst_12 = arith.constant dense<0.000000e+00> : vector<8xf32>
    %49 = vector.multi_reduction <add>, %48, %cst_12 [1] : vector<8x4xf32> to vector<8xf32>
    %50 = vector.shape_cast %49 : vector<8xf32> to vector<8x1xf32>
    %51 = tpu.reciprocal %50 {approx = true} : vector<8x1xf32> -> vector<8x1xf32>
    %52 = vector.broadcast %51 : vector<8x1xf32> to vector<8x4xf32>
    %53 = arith.mulf %48, %52 : vector<8x4xf32>
    %54 = vector.extract_strided_slice %53 {offsets = [0, 0], sizes = [8, 1], strides = [1, 1]} : vector<8x4xf32> to vector<8x1xf32>
    %55 = vector.extract_strided_slice %42 {offsets = [0, 0], sizes = [1, 128], strides = [1, 1]} : vector<4x128xf32> to vector<1x128xf32>
    %56 = vector.broadcast %54 : vector<8x1xf32> to vector<8x128xf32>
    %57 = vector.broadcast %55 : vector<1x128xf32> to vector<8x128xf32>
    %58 = arith.mulf %56, %57 : vector<8x128xf32>
    %59 = vector.extract_strided_slice %53 {offsets = [0, 1], sizes = [8, 1], strides = [1, 1]} : vector<8x4xf32> to vector<8x1xf32>
    %60 = vector.extract_strided_slice %42 {offsets = [1, 0], sizes = [1, 128], strides = [1, 1]} : vector<4x128xf32> to vector<1x128xf32>
    %61 = vector.broadcast %59 : vector<8x1xf32> to vector<8x128xf32>
    %62 = vector.broadcast %60 : vector<1x128xf32> to vector<8x128xf32>
    %63 = arith.mulf %61, %62 : vector<8x128xf32>
    %64 = arith.addf %58, %63 : vector<8x128xf32>
    %65 = vector.extract_strided_slice %53 {offsets = [0, 2], sizes = [8, 1], strides = [1, 1]} : vector<8x4xf32> to vector<8x1xf32>
    %66 = vector.extract_strided_slice %42 {offsets = [2, 0], sizes = [1, 128], strides = [1, 1]} : vector<4x128xf32> to vector<1x128xf32>
    %67 = vector.broadcast %65 : vector<8x1xf32> to vector<8x128xf32>
    %68 = vector.broadcast %66 : vector<1x128xf32> to vector<8x128xf32>
    %69 = arith.mulf %67, %68 : vector<8x128xf32>
    %70 = arith.addf %64, %69 : vector<8x128xf32>
    %71 = vector.extract_strided_slice %53 {offsets = [0, 3], sizes = [8, 1], strides = [1, 1]} : vector<8x4xf32> to vector<8x1xf32>
    %72 = vector.extract_strided_slice %42 {offsets = [3, 0], sizes = [1, 128], strides = [1, 1]} : vector<4x128xf32> to vector<1x128xf32>
    %73 = vector.broadcast %71 : vector<8x1xf32> to vector<8x128xf32>
    %74 = vector.broadcast %72 : vector<1x128xf32> to vector<8x128xf32>
    %75 = arith.mulf %73, %74 : vector<8x128xf32>
    %76 = arith.addf %70, %75 : vector<8x128xf32>
    %77 = tpu.concatenate %40, %76 in 0 : vector<8x128xf32>, vector<8x128xf32> -> vector<16x128xf32>
    %78 = vector.broadcast %3 : vector<1x128xf32> to vector<16x128xf32>
    %79 = arith.addf %77, %78 : vector<16x128xf32>
    %c0_13 = arith.constant 0 : index
    %c0_14 = arith.constant 0 : index
    %80 = vector.load %arg5[%c0_13, %c0_14] : memref<16x128xf32, #tpu.memory_space<vmem>>, vector<16x128xf32>
    tpu.vector_store %arg5[%c0_13, %c0_14], %79 {strides = array<i32>} : memref<16x128xf32, #tpu.memory_space<vmem>>, vector<16x128xf32>,
    return
  }
  func.func @transform_0(%arg0: i32) -> (i32, i32) {
    %c0_i32 = arith.constant 0 : i32
    %c0_i32_0 = arith.constant 0 : i32
    return %arg0, %c0_i32 : i32, i32
  }
  func.func @transform_1(%arg0: i32) -> (i32, i32) {
    %c0_i32 = arith.constant 0 : i32
    %c0_i32_0 = arith.constant 0 : i32
    %c0_i32_1 = arith.constant 0 : i32
    return %c0_i32, %c0_i32_0 : i32, i32
  }
  func.func @transform_2(%arg0: i32) -> (i32, i32) {
    %c0_i32 = arith.constant 0 : i32
    %c0_i32_0 = arith.constant 0 : i32
    %c0_i32_1 = arith.constant 0 : i32
    return %c0_i32, %c0_i32_0 : i32, i32
  }
  func.func @transform_3(%arg0: i32) -> (i32, i32) {
    %c0_i32 = arith.constant 0 : i32
    %c0_i32_0 = arith.constant 0 : i32
    %c0_i32_1 = arith.constant 0 : i32
    return %c0_i32, %c0_i32_0 : i32, i32
  }
  func.func @transform_4(%arg0: i32) -> (i32, i32) {
    %c0_i32 = arith.constant 0 : i32
    %c0_i32_0 = arith.constant 0 : i32
    return %arg0, %c0_i32 : i32, i32
  }
}

</mosaic_0001>

<bundles_post_ra>
// kernel: tpu_custom_call.1
= control target key start
LH: loop header
LB: loop body
LE: loop exit
PB: predicated region body
PF: predicated region fallthrough
CT: control target
= control target key end

     0   :  { %9 = vsyncpa [#allocation3], 0  ;;  %s661_s0 = inlined_call_operand.hbm [shape: f32[8,256], index: 0, kind: input, shape index: {}]   ;;  %s662_s1 = inlined_call_operand.hbm [shape: f32[8,256], index: 1, kind: input, shape index: {}]   ;;  %s663_s2 = inlined_call_operand.hbm [shape: f32[256,128], index: 2, kind: input, shape index: {}]   ;;  %s664_s3 = inlined_call_operand.vmem [shape: f32[1,128], index: 3, kind: input, shape index: {}]   ;;  %s665_s4 = inlined_call_operand.hbm [shape: f32[16,128], index: 4, kind: output, shape index: {}]  }
   0x1   :  { %10 = vsyncpa [#allocation6], 0 }
   0x2   :  { %11 = vsyncpa [#allocation4], 0  ;;  %s588_s15 = smov [#allocation5]   ;;  %s589_s17 = smov [#allocation2]  }
   0x3   :  { %s28_s16 = sshll.u32 %s588_s15, 4  ;;  %s18_s18 = sshll.u32 %s589_s17, 4  ;;  %s29_s16 = int_to_ptr.vmem [resolvable:$true] %s28_s16  ;;  %s19_s18 = int_to_ptr.vmem [resolvable:$true] %s18_s18 }
   0x4   :  { %s510_s19 = scalar_lea.vmem %s29_s16, 256  ;;  %p515_p1 = scmp.lt.s32.totalorder %s29_s16, %s29_s16 }
   0x5   :  { %p511_p0 = scmp.ne.s32.totalorder %s29_s16, %s510_s19  ;;  %p516_p2 = scmp.lt.s32.totalorder %s510_s19, %s510_s19 }
   0x7   :  { %p517_p3 = por %p516_p2, %p515_p1 }
   0x9   :  { %p518_p4 = pnand %p517_p3, %p511_p0 }
   0xb   :  { %521 = shalt.err (!%p518_p4)
}
   0xc   :  { %31 = dma.hbm_to_vmem [thread:$0]  %s662_s1, 256, %s29_s16, [#allocation6]  }
   0xd   :  { %s530_s22 = scalar_lea.vmem %s19_s18, 256  ;;  %p535_p6 = scmp.lt.s32.totalorder %s19_s18, %s19_s18 }
   0xe   :  { %p531_p5 = scmp.ne.s32.totalorder %s19_s18, %s530_s22  ;;  %p536_p7 = scmp.lt.s32.totalorder %s530_s22, %s530_s22 }
  0x10   :  { %p537_p8 = por %p536_p7, %p535_p6 }
  0x12   :  { %p538_p9 = pnand %p537_p8, %p531_p5 }
  0x14   :  { %541 = shalt.err (!%p538_p9)
}
  0x15   :  { %21 = dma.hbm_to_vmem [thread:$0]  %s661_s0, 256, %s19_s18, [#allocation3]  }
  0x16   :  { %s590_s25 = smov [#allocation7]  }
  0x17   :  { %s37_s26 = sshll.u32 %s590_s25, 4  ;;  %s38_s26 = int_to_ptr.vmem [resolvable:$true] %s37_s26 }
  0x18   :  { %s550_s27 = scalar_lea.vmem %s38_s26, 4096  ;;  %p555_p11 = scmp.lt.s32.totalorder %s38_s26, %s38_s26 }
  0x19   :  { %p551_p10 = scmp.ne.s32.totalorder %s38_s26, %s550_s27  ;;  %p556_p12 = scmp.lt.s32.totalorder %s550_s27, %s550_s27 }
  0x1b   :  { %p557_p13 = por %p556_p12, %p555_p11 }
  0x1d   :  { %p558_p0 = pnand %p557_p13, %p551_p10 }
  0x1f   :  { %561 = shalt.err (!%p558_p0)
}
  0x20   :  { %s591_s1 = smov 128   ;;  %s592_s28 = smov 8  }
  0x21   :  { %43 = dma.hbm_to_vmem [thread:$0]  %s663_s2, 4096, %s38_s26, [#allocation6], %s591_s1, %s591_s1, %s592_s28  }
  0x22   :  { %582 = dma.done.wait [#allocation3], 256  }
  0x23   :  { %583 = vsyncadd [#allocation3], 4294967040 }
  0x24   :  { %584 = dma.done.wait [#allocation6], 4352  }
  0x25   :  { %585 = vsyncadd [#allocation6], 4294962944  ;;  %v56_v0 = vld [vmem:[#allocation2 + $0x8] sm:$0xff]  ;;  %v635_v1 = vld [vmem:[#allocation2] sm:$0xff]  ;;  %vm232_vm0 = vcmask 31744   ;;  %v593_v54 = vmov 1  }
  0x26   :  { %v58_v2 = vld [vmem:[#allocation5 + $0x8] sm:$0xff]  ;;  %192 = vmatprep.subr.mxu1 %v56_v0  ;;  %v287_v3 = vrot.slane %v56_v0, 4  ;;  %v286_v4 = vrot.slane %v635_v1, 4  ;;  %v57_v5 = vld [vmem:[#allocation5] sm:$0xff]  ;;  %156 = vmatprep.mubr.f32.mxu0 %v56_v0  ;;  %v88_v16 = vld [vmem:[#allocation7 + $0xe8] sm:$0xff]  ;;  %v594_v55 = vmov 0   ;;  %v249_v0 = vlaneseq }
  0x27   :  { %226 = vmatprep.mubr.f32.mxu1 %v58_v2  ;;  %193 = vmatpush1.xpose.msra.mxu1 %v635_v1  ;;  %v90_v12 = vld [vmem:[#allocation7 + $0xf8] sm:$0xff]  ;;  %v89_v14 = vld [vmem:[#allocation7 + $0xf0] sm:$0xff]  ;;  %v72_v17 = vld [vmem:[#allocation7 + $0x68] sm:$0xff]  ;;  %v595_v60 = vmov 2   ;;  %v596_v61 = vmov 3  }
  0x28   :  { %320 = vmatprep.subr.mxu1 %v287_v3  ;;  %v74_v13 = vld [vmem:[#allocation7 + $0x78] sm:$0xff]  ;;  %440 = vmatprep.subr.mxu0 %v90_v12  ;;  %v73_v15 = vld [vmem:[#allocation7 + $0x70] sm:$0xff]  ;;  %v87_v18 = vld [vmem:[#allocation7 + $0xe0] sm:$0xff] }
  0x29   :  { %441 = vmatpush3.msra.mxu0 %v74_v13  ;;  %v71_v19 = vld [vmem:[#allocation7 + $0x60] sm:$0xff]  ;;  %v86_v20 = vld [vmem:[#allocation7 + $0xd8] sm:$0xff]  ;;  %v85_v22 = vld [vmem:[#allocation7 + $0xd0] sm:$0xff]  ;;  %486 = vset.pattern.permute.xlu1 %v593_v54 }
  0x2a   :  { %227 = vmatmul.mubr.f32.vlgmr.msra.gmra.mxu1 %v57_v5  ;;  %442 = vmatprep.subr.mxu0 %v89_v14  ;;  %v70_v21 = vld [vmem:[#allocation7 + $0x58] sm:$0xff]  ;;  %v69_v23 = vld [vmem:[#allocation7 + $0x50] sm:$0xff]  ;;  %v84_v24 = vld [vmem:[#allocation7 + $0xc8] sm:$0xff] }
  0x2b   :  { %321 = vmatpush1.xpose.msra.mxu1 %v286_v4  ;;  %354 = vmatprep.mubr.f32.mxu1 %v58_v2  ;;  %v68_v25 = vld [vmem:[#allocation7 + $0x48] sm:$0xff]  ;;  %v83_v26 = vld [vmem:[#allocation7 + $0xc0] sm:$0xff]  ;;  %v82_v28 = vld [vmem:[#allocation7 + $0xb8] sm:$0xff]  ;;  %v250_v2 = vshrl.u32 %v249_v0, 7 }
  0x2c   :  { %443 = vmatpush3.msra.mxu0 %v73_v15  ;;  %v67_v27 = vld [vmem:[#allocation7 + $0x40] sm:$0xff]  ;;  %v66_v29 = vld [vmem:[#allocation7 + $0x38] sm:$0xff]  ;;  %v81_v30 = vld [vmem:[#allocation7 + $0xb0] sm:$0xff]  ;;  %485 = vset.pattern.permute.xlu0 %v594_v55 }
  0x2d   :  { %444 = vmatprep.subr.mxu0 %v88_v16  ;;  %v65_v31 = vld [vmem:[#allocation7 + $0x30] sm:$0xff]  ;;  %v80_v32 = vld [vmem:[#allocation7 + $0xa8] sm:$0xff]  ;;  %v79_v34 = vld [vmem:[#allocation7 + $0xa0] sm:$0xff]  ;;  %v280_v13 = vsub.s32 3, %v250_v2 }
  0x2e   :  { %355 = vmatmul.mubr.f32.vlgmr.msra.gmra.mxu1 %v57_v5  ;;  %445 = vmatpush3.msra.mxu0 %v72_v17  ;;  %v64_v33 = vld [vmem:[#allocation7 + $0x28] sm:$0xff]  ;;  %v63_v35 = vld [vmem:[#allocation7 + $0x20] sm:$0xff]  ;;  %v78_v36 = vld [vmem:[#allocation7 + $0x98] sm:$0xff]  ;;  %v260_v5 = vsub.s32 1, %v250_v2 }
  0x2f   :  { %446 = vmatprep.subr.mxu0 %v87_v18  ;;  %v62_v37 = vld [vmem:[#allocation7 + $0x18] sm:$0xff]  ;;  %v77_v38 = vld [vmem:[#allocation7 + $0x90] sm:$0xff]  ;;  %v76_v40 = vld [vmem:[#allocation7 + $0x88] sm:$0xff] }
  0x30   :  { %447 = vmatpush3.msra.mxu0 %v71_v19  ;;  %v61_v39 = vld [vmem:[#allocation7 + $0x10] sm:$0xff]  ;;  %v60_v41 = vld [vmem:[#allocation7 + $0x8] sm:$0xff]  ;;  %v75_v42 = vld [vmem:[#allocation7 + $0x80] sm:$0xff] }
  0x31   :  { %448 = vmatprep.subr.mxu0 %v86_v20  ;;  %v59_v43 = vld [vmem:[#allocation7] sm:$0xff] }
  0x32   :  { %449 = vmatpush3.msra.mxu0 %v70_v21 }
  0x33   :  { %450 = vmatprep.subr.mxu0 %v85_v22 }
  0x34   :  { %451 = vmatpush3.msra.mxu0 %v69_v23  ;;  %v439_v23 = vld [vmem:[%s664_s3] ss:$0 sm:$0xff]  ;;  %s597_s3 = smov [#allocation8]  }
  0x35   :  { %452 = vmatprep.subr.mxu0 %v84_v24  ;;  %s426_s5 = sshll.u32 %s597_s3, 4  ;;  %s427_s5 = int_to_ptr.vmem [resolvable:$true] %s426_s5 }
  0x36   :  { %453 = vmatpush3.msra.mxu0 %v68_v25  ;;  %s562_s6 = scalar_lea.vmem %s427_s5, 256  ;;  %p567_p2 = scmp.lt.s32.totalorder %s427_s5, %s427_s5 }
  0x37   :  { %454 = vmatprep.subr.mxu0 %v83_v26  ;;  %p563_p1 = scmp.ne.s32.totalorder %s427_s5, %s562_s6  ;;  %p568_p3 = scmp.lt.s32.totalorder %s562_s6, %s562_s6 }
  0x38   :  { %455 = vmatpush3.msra.mxu0 %v67_v27  ;;  %v387_v27 = vsub.s32 5, %v250_v2 }
  0x39   :  { %456 = vmatprep.subr.mxu0 %v82_v28  ;;  %v378_v28 = vsub.s32 4, %v250_v2  ;;  %p569_p4 = por %p568_p3, %p567_p2 }
  0x3a   :  { %457 = vmatpush3.msra.mxu0 %v66_v29  ;;  %v397_v29 = vsub.s32 6, %v250_v2 }
  0x3b   :  { %458 = vmatprep.subr.mxu0 %v81_v30  ;;  %p570_p5 = pnand %p569_p4, %p563_p1 }
  0x3c   :  { %459 = vmatpush3.msra.mxu0 %v65_v31 }
  0x3d   :  { %460 = vmatprep.subr.mxu0 %v80_v32 }
  0x3e   :  { %461 = vmatpush3.msra.mxu0 %v64_v33 }
  0x3f   :  { %462 = vmatprep.subr.mxu0 %v79_v34 }
  0x40   :  { %463 = vmatpush3.msra.mxu0 %v63_v35 }
  0x41   :  { %464 = vmatprep.subr.mxu0 %v78_v36  ;;  %v407_v36 = vsub.s32 7, %v250_v2 }
  0x42   :  { %465 = vmatpush3.msra.mxu0 %v62_v37 }
  0x43   :  { %466 = vmatprep.subr.mxu0 %v77_v38 }
  0x44   :  { %467 = vmatpush3.msra.mxu0 %v61_v39 }
  0x45   :  { %468 = vmatprep.subr.mxu0 %v76_v40 }
  0x46   :  { %469 = vmatpush3.msra.mxu0 %v60_v41 }
  0x47   :  { %470 = vmatprep.subr.mxu0 %v75_v42 }
  0x48   :  { %471 = vmatpush3.msra.mxu0 %v59_v43 }
  0x49   :  { %157 = vmatmul.mubr.f32.vlgmr.msra.gmra.mxu0 %v635_v1 }
  0xea   :  { %v639_v6 = vpop.f32.mrf.mxu1 }
  0xeb   :  { %v233_v7 = vsel %vm232_vm0, %v639_v6, -inf }
  0xec   :  { %234 = vmax.xlane.f32.xlu0 %v233_v7  ;;  %v230_v8 = vpop.f32.mrf.mxu1  ;;  %v270_v7 = vsub.s32 2, %v250_v2 }
  0xee   :  { %v643_v9 = vpop.f32.mrf.mxu1 }
  0xef   :  { %v360_v10 = vsel %vm232_vm0, %v643_v9, -inf }
  0xf0   :  { %361 = vmax.xlane.f32.xlu0 %v360_v10  ;;  %v358_v11 = vpop.f32.mrf.mxu1 }
 0x109   :  { %v472_v1 = vpop.f32.mrf.mxu0 }
 0x10b   :  { %v473_v3 = vpop.f32.mrf.mxu0 }
 0x10c   :  { %v474_v4 = vadd.f32 %v473_v3, %v472_v1 }
 0x10e   :  { %v271_v12 = vrot.slane %v474_v4, %v270_v7  ;;  %v281_v18 = vrot.slane %v474_v4, %v280_v13  ;;  %v388_v31 = vrot.slane %v474_v4, %v387_v27  ;;  %v379_v32 = vrot.slane %v474_v4, %v378_v28 }
 0x10f   :  { %v398_v33 = vrot.slane %v474_v4, %v397_v29  ;;  %v408_v40 = vrot.slane %v474_v4, %v407_v36 }
 0x175   :  { %v235_v44 = vpop.xlane.xlu0 %234 }
 0x176   :  { %v236_v45 = vsub.f32 %v639_v6, %v235_v44  ;;  %v251_v6 = vsub.s32 0, %v250_v2 }
 0x178   :  { %v237_v46 = vmul.f32 1.442695, %v236_v45  ;;  %v252_v10 = vrot.slane %v474_v4, %v251_v6 }
 0x179   :  { %v362_v47 = vpop.xlane.xlu0 %361 }
 0x17a   :  { %494 = vpow2.f32 %v237_v46  ;;  %v363_v48 = vsub.f32 %v643_v9, %v362_v47  ;;  %v261_v9 = vrot.slane %v474_v4, %v260_v5 }
 0x17c   :  { %v364_v49 = vmul.f32 1.442695, %v363_v48 }
 0x17e   :  { %496 = vpow2.f32 %v364_v49 }
 0x187   :  { %v495_v50 = vpop.eup %494 }
 0x188   :  { %v239_v51 = vsel %vm232_vm0, %v495_v50, 0.0 }
 0x189   :  { %240 = vadd.xlane.f32.xlu1 %v239_v51 }
 0x18b   :  { %v497_v52 = vpop.eup %496 }
 0x18c   :  { %v366_v53 = vsel %vm232_vm0, %v497_v52, 0.0 }
 0x18d   :  { %367 = vadd.xlane.f32.xlu1 %v366_v53 }
 0x212   :  { %v241_v56 = vpop.xlane.xlu1 %240 }
 0x213   :  { %498 = vrcp.f32 %v241_v56 }
 0x216   :  { %v368_v57 = vpop.xlane.xlu1 %367 }
 0x217   :  { %500 = vrcp.f32 %v368_v57 }
 0x220   :  { %v499_v58 = vpop.eup %498 }
 0x221   :  { %v243_v59 = vmul.f32 %v499_v58, %v495_v50 }
 0x223   :  { %246 = vperm.xlu0 %485, %v243_v59   ;;  %255 = vperm.xlu1 %486, %v243_v59  }
 0x224   :  { %v501_v62 = vpop.eup %500 }
 0x225   :  { %v370_v63 = vmul.f32 %v501_v62, %v497_v52 }
 0x227   :  { %487 = vset.pattern.permute.xlu1 %v595_v60  ;;  %493 = vset.pattern.permute.xlu0 %v596_v61 }
 0x228   :  { %265 = vperm.xlu1 %487, %v243_v59  }
 0x22c   :  { %488 = vset.pattern.permute.xlu1 %v596_v61 }
 0x22d   :  { %275 = vperm.xlu1 %488, %v243_v59  }
 0x231   :  { %489 = vset.pattern.permute.xlu1 %v594_v55 }
 0x232   :  { %373 = vperm.xlu1 %489, %v370_v63  }
 0x236   :  { %490 = vset.pattern.permute.xlu1 %v593_v54 }
 0x237   :  { %382 = vperm.xlu1 %490, %v370_v63  }
 0x23b   :  { %491 = vset.pattern.permute.xlu1 %v595_v60 }
 0x23c   :  { %392 = vperm.xlu1 %491, %v370_v63  }
 0x240   :  { %492 = vset.pattern.permute.xlu1 %v596_v61 }
 0x241   :  { %402 = vperm.xlu1 %492, %v370_v63  }
 0x29e   :  { %v256_v8 = vpop.permute.xlu1 %255  ;;  %v247_v11 = vpop.permute.xlu0 %246 }
 0x29f   :  { %v262_v14 = vmul.f32 %v261_v9, %v256_v8  ;;  %v253_v15 = vmul.f32 %v252_v10, %v247_v11 }
 0x2a1   :  { %v263_v19 = vadd.f32 %v262_v14, %v253_v15 }
 0x2a3   :  { %v266_v16 = vpop.permute.xlu1 %265 }
 0x2a4   :  { %v272_v17 = vmul.f32 %v271_v12, %v266_v16 }
 0x2a6   :  { %v273_v21 = vadd.f32 %v272_v17, %v263_v19 }
 0x2a8   :  { %v276_v20 = vpop.permute.xlu1 %275 }
 0x2a9   :  { %v282_v22 = vmul.f32 %v281_v18, %v276_v20 }
 0x2ab   :  { %v283_v24 = vadd.f32 %v282_v22, %v273_v21 }
 0x2ad   :  { %v417_v25 = vadd.f32 %v439_v23, %v283_v24  ;;  %v374_v26 = vpop.permute.xlu1 %373 }
 0x2ae   :  { %v380_v37 = vmul.f32 %v379_v32, %v374_v26 }
 0x2af   :  { %419 = vst [vmem:[#allocation8] sm:$0xff] %v417_v25 }
 0x2b2   :  { %v383_v30 = vpop.permute.xlu1 %382 }
 0x2b3   :  { %v389_v34 = vmul.f32 %v388_v31, %v383_v30 }
 0x2b5   :  { %v390_v39 = vadd.f32 %v389_v34, %v380_v37 }
 0x2b7   :  { %v393_v35 = vpop.permute.xlu1 %392 }
 0x2b8   :  { %v399_v38 = vmul.f32 %v398_v33, %v393_v35 }
 0x2ba   :  { %v400_v42 = vadd.f32 %v399_v38, %v390_v39 }
 0x2bc   :  { %v403_v41 = vpop.permute.xlu1 %402 }
 0x2bd   :  { %v409_v43 = vmul.f32 %v408_v40, %v403_v41 }
 0x2bf   :  { %v410_v44 = vadd.f32 %v409_v43, %v400_v42 }
 0x2c1   :  { %v418_v45 = vadd.f32 %v439_v23, %v410_v44 }
 0x2c3   :  { %420 = vst [vmem:[#allocation8 + $0x8] sm:$0xff] %v418_v45 }
 0x2c4   :  { %573 = shalt.err (!%p570_p5)
}
 0x2c5   :  { %432 = dma.vmem_to_hbm [thread:$0]  %s427_s5, 256, %s665_s4, [#allocation4], %s591_s1, %s591_s1, %s592_s28  }
 0x2c6   :  { %586 = dma.done.wait [#allocation4], 256  }
 0x2c7   :  { %587 = vsyncadd [#allocation4], 4294967040 }
 0x2c8   :  { %436 = vsyncpa [#allocation3], 1 }
 0x2c9   :  { %437 = vsyncpa [#allocation6], 1 }
 0x2ca   :  { %438 = vsyncpa [#allocation4], 1 }

</bundles_post_ra>
